<compile_context>
chip_gen: v7x
topology: tpu7x:2x2x1
jax: 0.10.0
libtpu: 0.0.40
codegen_flags: <defaults>
</compile_context>

<pallas_src>
import functools

import jax
import jax.numpy as jnp
from jax.experimental import pallas as pl
from jax.experimental.pallas import tpu as pltpu


def _focal_factor(one_minus_p, gamma):
    """(1 - p) ** gamma, specialized to multiplies for integer gamma."""
    g = float(gamma)
    if g == 0.0:
        return jnp.ones_like(one_minus_p)
    if g.is_integer() and 0.0 < g <= 64.0:
        n = int(g)
        result = None
        base = one_minus_p
        while n:
            if n & 1:
                result = base if result is None else result * base
            n >>= 1
            if n:
                base = base * base
        return result
    # Non-integer gamma: fall back to pow (1 - p >= 0 for valid pixels).
    return jnp.power(one_minus_p, g)


def _focal_loss_kernel(logits_ref, labels_ref, psum_ref, pcnt_ref,
                       *, gamma, ignore_lb, hw, tile_p):
    p = pl.program_id(1)                           # pixel-chunk index ("arbitrary")

    # Output blocks are resident across the pixel-chunk axis; zero them once.
    @pl.when(p == 0)
    def _():
        psum_ref[...] = jnp.zeros_like(psum_ref)
        pcnt_ref[...] = jnp.zeros_like(pcnt_ref)

    x = logits_ref[0].astype(jnp.float32)          # (C, TILE_P): classes on sublanes
    lbl = labels_ref[0]                            # (1, TILE_P) int32

    # Ragged-tail mask by global pixel index (replaces the HBM pad copy).
    lane = jax.lax.broadcasted_iota(jnp.int32, lbl.shape, 1)   # (1, TILE_P)
    in_bounds = (p * tile_p + lane) < hw                       # (1, TILE_P) bool

    # Numerically stable softmax statistics over the class (sublane) axis.
    m = jnp.max(x, axis=0, keepdims=True)          # (1, TILE_P)
    xm = x - m                                     # (C, TILE_P)
    e = jnp.exp(xm)                                # the only full-C transcendental
    s = jnp.sum(e, axis=0, keepdims=True)          # (1, TILE_P)
    log_s = jnp.log(s)                             # (1, TILE_P)

    # Gather xm at the label class first, then apply the focal weighting to the
    # picked per-pixel values only.
    cls = jax.lax.broadcasted_iota(jnp.int32, x.shape, 0)      # (C, TILE_P)
    onehot = cls == lbl                                        # (C, TILE_P) bool
    picked_xm = jnp.sum(jnp.where(onehot, xm, 0.0), axis=0, keepdims=True)

    picked_logp = picked_xm - log_s                # log_softmax at the label
    picked_p = jnp.exp(picked_logp)                # softmax at the label
    factor = _focal_factor(1.0 - picked_p, gamma)
    loss_px = -(factor * picked_logp)              # (1, TILE_P)

    valid = (lbl != ignore_lb) & in_bounds         # (1, TILE_P) bool
    contrib = jnp.where(valid, loss_px, 0.0)       # select kills garbage-lane NaNs

    tile_sum = jnp.sum(contrib, axis=1, keepdims=True)                    # (1, 1)
    tile_cnt = jnp.sum(valid.astype(jnp.float32), axis=1, keepdims=True)  # (1, 1)

    psum_ref[0] += tile_sum
    pcnt_ref[0] += tile_cnt


def _choose_tile_pixels(HW, C, max_tile_pixels, vmem_working_budget):
    """Largest lane-aligned (multiple-of-128) pixel tile that fits the VMEM
    working-set budget.  No exact-divisor search: a ragged tail is masked
    in-kernel, so we never degrade to tiny tiles."""
    c_pad = ((C + 7) // 8) * 8
    # Double-buffered f32 logits tile + sublane-padded int32 labels tile.
    bytes_per_pixel = (c_pad + 8) * 4 * 2
    cap = min(int(max_tile_pixels), vmem_working_budget // bytes_per_pixel)
    cap = max(128, (cap // 128) * 128)
    hw_pad = ((HW + 127) // 128) * 128
    return min(cap, hw_pad)


def softmax_focal_loss(logits, labels, *, gamma=2.0, ignore_lb=255,
                       max_tile_pixels=65536):
    """logits: (N, C, H, W) float, labels: (N, H, W) int -> scalar loss."""
    N, C, H, W = logits.shape
    HW = H * W

    # Free reshapes -- no transpose, no pad, no dtype up-cast pass in HBM.
    x = logits.reshape(N, C, HW)
    y = labels.reshape(N, 1, HW)
    if y.dtype != jnp.int32:
        y = y.astype(jnp.int32)

    tile_p = _choose_tile_pixels(HW, C, max_tile_pixels,
                                 vmem_working_budget=20 * 1024 * 1024)
    n_p = pl.cdiv(HW, tile_p)

    kernel = functools.partial(_focal_loss_kernel,
                               gamma=float(gamma), ignore_lb=int(ignore_lb),
                               hw=HW, tile_p=tile_p)

    cost = pl.CostEstimate(
        flops=int(N * HW * (6 * C + 12)),
        transcendentals=int(N * HW * (C + 2)),
        bytes_accessed=int(x.size * x.dtype.itemsize + y.size * 4 + N * 8),
    )

    psum, pcnt = pl.pallas_call(
        kernel,
        out_shape=(jax.ShapeDtypeStruct((N, 1, 1), jnp.float32),
                   jax.ShapeDtypeStruct((N, 1, 1), jnp.float32)),
        grid_spec=pltpu.PrefetchScalarGridSpec(
            num_scalar_prefetch=0,
            grid=(N, n_p),
            in_specs=[
                pl.BlockSpec((1, C, tile_p), lambda b, p: (b, 0, p)),
                pl.BlockSpec((1, 1, tile_p), lambda b, p: (b, 0, p)),
            ],
            out_specs=[
                pl.BlockSpec((1, 1, 1), lambda b, p: (b, 0, 0)),
                pl.BlockSpec((1, 1, 1), lambda b, p: (b, 0, 0)),
            ],
        ),
        compiler_params=pltpu.CompilerParams(
            dimension_semantics=("parallel", "arbitrary"),
            vmem_limit_bytes=32 * 1024 * 1024),
        cost_estimate=cost,
    )(x, y)

    total = jnp.sum(psum)
    count = jnp.sum(pcnt)
    # NLLLoss(reduction='mean'): divide by number of non-ignored elements.
    # (count == 0 gives NaN, matching PyTorch's behavior for all-ignored input.)
    return (total / count).astype(jnp.float32)


def _reference_loss(logits, labels, gamma, ignore_lb):
    # Pure-JAX reference replicating the PyTorch module.
    x = logits.astype(jnp.float32)
    scores = jax.nn.softmax(x, axis=1)
    factor = jnp.power(1.0 - scores, gamma)
    log_score = factor * jax.nn.log_softmax(x, axis=1)   # (N, C, H, W)
    valid = labels != ignore_lb
    safe_lbl = jnp.where(valid, labels, 0)
    gathered = jnp.take_along_axis(log_score, safe_lbl[:, None, :, :], axis=1)[:, 0]
    per_elem = jnp.where(valid, -gathered, 0.0)
    return jnp.sum(per_elem) / jnp.sum(valid.astype(jnp.float32))


if __name__ == "__main__":
    key = jax.random.PRNGKey(0)
    N, C, H, W = 2, 4, 16, 16
    gamma = 2.0
    ignore_lb = 255

    k1, k2, k3 = jax.random.split(key, 3)
    logits = jax.random.normal(k1, (N, C, H, W), dtype=jnp.float32)
    labels = jax.random.randint(k2, (N, H, W), 0, C, dtype=jnp.int32)
    # Sprinkle some ignored pixels.
    ignore_mask = jax.random.bernoulli(k3, 0.1, (N, H, W))
    labels = jnp.where(ignore_mask, jnp.int32(ignore_lb), labels)

    loss = softmax_focal_loss(logits, labels, gamma=gamma, ignore_lb=ignore_lb)
    loss = jax.block_until_ready(loss)

    ref = _reference_loss(logits, labels, gamma, ignore_lb)
    assert jnp.allclose(loss, ref, rtol=1e-5, atol=1e-5), (loss, ref)

    print("KERNEL_OK")
</pallas_src>

<mosaic_0001>
module attributes {stable_mosaic.version = 11 : i64} {
  func.func @_focal_loss_kernel(%arg0: i32, %arg1: i32, %arg2: memref<1x4x256xf32, #tpu.memory_space<vmem>>, %arg3: memref<1x1x256xi32, #tpu.memory_space<vmem>>, %arg4: memref<1x1x1xf32, #tpu.memory_space<vmem>>, %arg5: memref<1x1x1xf32, #tpu.memory_space<vmem>>) attributes {dimension_semantics = [#tpu.dimension_semantics<parallel>, #tpu.dimension_semantics<arbitrary>], iteration_bounds = array<i64: 2, 1>, scalar_prefetch = 0 : i64, scratch_operands = 0 : i64, tpu.core_type = #tpu.core_type<tc>, window_params = [{transform_indices = @transform_0, window_bounds = array<i64: 1, 4, 256>}, {transform_indices = @transform_1, window_bounds = array<i64: 1, 1, 256>}, {transform_indices = @transform_2, window_bounds = array<i64: 1, 1, 1>}, {transform_indices = @transform_3, window_bounds = array<i64: 1, 1, 1>}]} {
    %c0_i32 = arith.constant 0 : i32
    %0 = arith.cmpi eq, %arg1, %c0_i32 : i32
    %1 = arith.extui %0 : i1 to i32
    %c0_i32_0 = arith.constant 0 : i32
    %2 = arith.cmpi ne, %1, %c0_i32_0 : i32
    scf.if %2 {
      %cst_27 = arith.constant 0.000000e+00 : f32
      %59 = vector.broadcast %cst_27 : f32 to vector<1x1x1xf32>
      %c0_28 = arith.constant 0 : index
      %c0_29 = arith.constant 0 : index
      %c0_30 = arith.constant 0 : index
      %60 = vector.load %arg4[%c0_28, %c0_29, %c0_30] : memref<1x1x1xf32, #tpu.memory_space<vmem>>, vector<1x1x1xf32>
      tpu.vector_store %arg4[%c0_28, %c0_29, %c0_30], %59 {strides = array<i32>} : memref<1x1x1xf32, #tpu.memory_space<vmem>>, vector<1x1x1xf32>,
      %cst_31 = arith.constant 0.000000e+00 : f32
      %61 = vector.broadcast %cst_31 : f32 to vector<1x1x1xf32>
      %c0_32 = arith.constant 0 : index
      %c0_33 = arith.constant 0 : index
      %c0_34 = arith.constant 0 : index
      %62 = vector.load %arg5[%c0_32, %c0_33, %c0_34] : memref<1x1x1xf32, #tpu.memory_space<vmem>>, vector<1x1x1xf32>
      tpu.vector_store %arg5[%c0_32, %c0_33, %c0_34], %61 {strides = array<i32>} : memref<1x1x1xf32, #tpu.memory_space<vmem>>, vector<1x1x1xf32>,
    } else {
    }
    %c0 = arith.constant 0 : index
    %c0_1 = arith.constant 0 : index
    %c0_2 = arith.constant 0 : index
    %3 = vector.load %arg2[%c0, %c0_1, %c0_2] : memref<1x4x256xf32, #tpu.memory_space<vmem>>, vector<1x4x256xf32>
    %4 = vector.shape_cast %3 : vector<1x4x256xf32> to vector<4x256xf32>
    %c0_3 = arith.constant 0 : index
    %c0_4 = arith.constant 0 : index
    %c0_5 = arith.constant 0 : index
    %5 = vector.load %arg3[%c0_3, %c0_4, %c0_5] : memref<1x1x256xi32, #tpu.memory_space<vmem>>, vector<1x1x256xi32>
    %6 = vector.shape_cast %5 : vector<1x1x256xi32> to vector<1x256xi32>
    %7 = tpu.iota {dimensions = array<i32: 1>} : vector<1x256xi32>
    %c256_i32 = arith.constant 256 : i32
    %8 = arith.muli %arg1, %c256_i32 : i32
    %9 = vector.broadcast %8 : i32 to vector<1x256xi32>
    %10 = arith.addi %9, %7 : vector<1x256xi32>
    %c256_i32_6 = arith.constant 256 : i32
    %11 = vector.broadcast %c256_i32_6 : i32 to vector<1x256xi32>
    %12 = arith.cmpi slt, %10, %11 : vector<1x256xi32>
    %cst = arith.constant dense<0xFF800000> : vector<256xf32>
    %13 = vector.multi_reduction <maximumf>, %4, %cst [0] : vector<4x256xf32> to vector<256xf32>
    %14 = vector.shape_cast %13 : vector<256xf32> to vector<1x256xf32>
    %15 = vector.broadcast %14 : vector<1x256xf32> to vector<4x256xf32>
    %16 = arith.subf %4, %15 : vector<4x256xf32>
    %17 = math.exp %16 : vector<4x256xf32>
    %cst_7 = arith.constant dense<0.000000e+00> : vector<256xf32>
    %18 = vector.multi_reduction <add>, %17, %cst_7 [0] : vector<4x256xf32> to vector<256xf32>
    %19 = vector.shape_cast %18 : vector<256xf32> to vector<1x256xf32>
    %20 = math.log %19 : vector<1x256xf32>
    %21 = tpu.iota {dimensions = array<i32: 0>} : vector<4x256xi32>
    %22 = vector.broadcast %6 : vector<1x256xi32> to vector<4x256xi32>
    %23 = arith.cmpi eq, %21, %22 : vector<4x256xi32>
    %cst_8 = arith.constant 0.000000e+00 : f32
    %24 = vector.broadcast %cst_8 : f32 to vector<4x256xf32>
    %25 = arith.select %23, %16, %24 : vector<4x256xi1>, vector<4x256xf32>
    %cst_9 = arith.constant dense<0.000000e+00> : vector<256xf32>
    %26 = vector.multi_reduction <add>, %25, %cst_9 [0] : vector<4x256xf32> to vector<256xf32>
    %27 = vector.shape_cast %26 : vector<256xf32> to vector<1x256xf32>
    %28 = arith.subf %27, %20 : vector<1x256xf32>
    %29 = math.exp %28 : vector<1x256xf32>
    %cst_10 = arith.constant 1.000000e+00 : f32
    %30 = vector.broadcast %cst_10 : f32 to vector<1x256xf32>
    %31 = arith.subf %30, %29 : vector<1x256xf32>
    %32 = arith.mulf %31, %31 : vector<1x256xf32>
    %33 = arith.mulf %32, %28 : vector<1x256xf32>
    %cst_11 = arith.constant 0.000000e+00 : f32
    %34 = vector.broadcast %cst_11 : f32 to vector<1x256xf32>
    %35 = arith.subf %34, %33 : vector<1x256xf32>
    %c255_i32 = arith.constant 255 : i32
    %36 = vector.broadcast %c255_i32 : i32 to vector<1x256xi32>
    %37 = arith.cmpi ne, %6, %36 : vector<1x256xi32>
    %38 = arith.andi %37, %12 : vector<1x256xi1>
    %cst_12 = arith.constant 0.000000e+00 : f32
    %39 = vector.broadcast %cst_12 : f32 to vector<1x256xf32>
    %40 = arith.select %38, %35, %39 : vector<1x256xi1>, vector<1x256xf32>
    %cst_13 = arith.constant dense<0.000000e+00> : vector<1xf32>
    %41 = vector.multi_reduction <add>, %40, %cst_13 [1] : vector<1x256xf32> to vector<1xf32>
    %42 = vector.shape_cast %41 : vector<1xf32> to vector<1x1xf32>
    %43 = arith.extui %38 : vector<1x256xi1> to vector<1x256xi32>
    %44 = arith.sitofp %43 : vector<1x256xi32> to vector<1x256xf32>
    %cst_14 = arith.constant dense<0.000000e+00> : vector<1xf32>
    %45 = vector.multi_reduction <add>, %44, %cst_14 [1] : vector<1x256xf32> to vector<1xf32>
    %46 = vector.shape_cast %45 : vector<1xf32> to vector<1x1xf32>
    %c0_15 = arith.constant 0 : index
    %c0_16 = arith.constant 0 : index
    %c0_17 = arith.constant 0 : index
    %47 = vector.load %arg4[%c0_15, %c0_16, %c0_17] : memref<1x1x1xf32, #tpu.memory_space<vmem>>, vector<1x1x1xf32>
    %48 = vector.shape_cast %47 : vector<1x1x1xf32> to vector<1x1xf32>
    %49 = arith.addf %48, %42 : vector<1x1xf32>
    %c0_18 = arith.constant 0 : index
    %c0_19 = arith.constant 0 : index
    %c0_20 = arith.constant 0 : index
    %50 = vector.load %arg4[%c0_18, %c0_19, %c0_20] : memref<1x1x1xf32, #tpu.memory_space<vmem>>, vector<1x1x1xf32>
    %51 = vector.shape_cast %50 : vector<1x1x1xf32> to vector<1x1xf32>
    %52 = vector.shape_cast %49 : vector<1x1xf32> to vector<1x1x1xf32>
    tpu.vector_store %arg4[%c0_18, %c0_19, %c0_20], %52 {strides = array<i32>} : memref<1x1x1xf32, #tpu.memory_space<vmem>>, vector<1x1x1xf32>,
    %c0_21 = arith.constant 0 : index
    %c0_22 = arith.constant 0 : index
    %c0_23 = arith.constant 0 : index
    %53 = vector.load %arg5[%c0_21, %c0_22, %c0_23] : memref<1x1x1xf32, #tpu.memory_space<vmem>>, vector<1x1x1xf32>
    %54 = vector.shape_cast %53 : vector<1x1x1xf32> to vector<1x1xf32>
    %55 = arith.addf %54, %46 : vector<1x1xf32>
    %c0_24 = arith.constant 0 : index
    %c0_25 = arith.constant 0 : index
    %c0_26 = arith.constant 0 : index
    %56 = vector.load %arg5[%c0_24, %c0_25, %c0_26] : memref<1x1x1xf32, #tpu.memory_space<vmem>>, vector<1x1x1xf32>
    %57 = vector.shape_cast %56 : vector<1x1x1xf32> to vector<1x1xf32>
    %58 = vector.shape_cast %55 : vector<1x1xf32> to vector<1x1x1xf32>
    tpu.vector_store %arg5[%c0_24, %c0_25, %c0_26], %58 {strides = array<i32>} : memref<1x1x1xf32, #tpu.memory_space<vmem>>, vector<1x1x1xf32>,
    return
  }
  func.func @transform_0(%arg0: i32, %arg1: i32) -> (i32, i32, i32) {
    %c0_i32 = arith.constant 0 : i32
    %c0_i32_0 = arith.constant 0 : i32
    return %arg0, %c0_i32, %arg1 : i32, i32, i32
  }
  func.func @transform_1(%arg0: i32, %arg1: i32) -> (i32, i32, i32) {
    %c0_i32 = arith.constant 0 : i32
    %c0_i32_0 = arith.constant 0 : i32
    return %arg0, %c0_i32, %arg1 : i32, i32, i32
  }
  func.func @transform_2(%arg0: i32, %arg1: i32) -> (i32, i32, i32) {
    %c0_i32 = arith.constant 0 : i32
    %c0_i32_0 = arith.constant 0 : i32
    %c0_i32_1 = arith.constant 0 : i32
    return %arg0, %c0_i32, %c0_i32_0 : i32, i32, i32
  }
  func.func @transform_3(%arg0: i32, %arg1: i32) -> (i32, i32, i32) {
    %c0_i32 = arith.constant 0 : i32
    %c0_i32_0 = arith.constant 0 : i32
    %c0_i32_1 = arith.constant 0 : i32
    return %arg0, %c0_i32, %c0_i32_0 : i32, i32, i32
  }
}

</mosaic_0001>

<bundles_post_ra>
// kernel: tpu_custom_call.1
= control target key start
LH: loop header
LB: loop body
LE: loop exit
PB: predicated region body
PF: predicated region fallthrough
CT: control target
= control target key end

     0   :  { %9 = vsyncpa [#allocation3], 0  ;;  %s1007_s0 = inlined_call_operand.hbm [shape: f32[2,4,256], index: 0, kind: input, shape index: {}]   ;;  %s1008_s1 = inlined_call_operand.hbm [shape: s32[2,1,256], index: 1, kind: input, shape index: {}]   ;;  %s1009_s2 = inlined_call_operand.vmem [shape: f32[2,1,1], index: 2, kind: output, shape index: {0}]   ;;  %s1010_s3 = inlined_call_operand.vmem [shape: f32[2,1,1], index: 3, kind: output, shape index: {1}]  }
   0x1   :  { %11 = vsyncpa [#allocation3 + $0x1], 0 }
   0x2   :  { %12 = vsyncpa [#allocation5], 0 }
   0x3   :  { %14 = vsyncpa [#allocation5 + $0x1], 0  ;;  %s798_s12 = smov 0   ;;  %s800_s13 = smov 0  }
   0x4   :  { %s802_s14 = smov 0   ;;  %s804_s15 = smov 0  }
   0x5   :  { %s806_s16 = smov 0   ;;  %s808_s17 = smov 0  }
   0x6 LB: > { %s565_s18 = sadd.s32 4294967295, %s771_s17   ;;  %s32_s19 = sadd.s32 1, %s767_s16  ;;  %s771_s17 = sphi %s808_s17, %s20_s17   ;;  %s767_s16 = sphi %s806_s16, %s1024_s16   ;;  %s763_s15 = sphi %s804_s15, %s1023_s15   ;;  %s759_s14 = sphi %s802_s14, %s1022_s14   ;;  %s755_s13 = sphi %s800_s13, %s1021_s13   ;;  %s751_s12 = sphi %s798_s12, %s1020_s12  }
   0x7   : > { %p34_p0 = scmp.ge.s32.totalorder %s32_s19, 2  ;;  %s41_s20 = sadd.s32 1, %s759_s14 }
   0x8   : > { %p48_p1 = scmp.ne.s32.totalorder %s759_s14, %s755_s13  ;;  %p49_p2 = scmp.eq.s32.totalorder %s771_s17, 0 }
   0x9   : > { %s1026_s19 = smov (%p34_p0, %s32_s19), 0  ;;  %p54_p4 = scmp.ne.s32.totalorder %s755_s13, %s751_s12 }
   0xa   : > { %p834_p3 = por %p49_p2, %p48_p1  ;;  %s36_s22 = ssub.s32 %s767_s16, %s1026_s19 }
   0xb   : > { %p55_p5 = scmp.eq.s32.totalorder %s565_s18, 0  ;;  %p39_p6 = scmp.eq.s32.totalorder %s36_s22, 0 }
   0xc   : > { %p594_p8 = scmp.lt.s32.totalorder %s771_s17, 2  ;;  %s850_s25 = sand.u32 1, %s759_s14  }
   0xd   : > { %p841_p7 = por %p55_p5, %p54_p4  ;;  %s581_s26 = sshll.u32 %s767_s16, 7 }
   0xe   : > { %s847_s24 = scalar_select %p39_p6, %s759_s14, %s41_s20  }
   0xf   : > { %s1013_s23 = scalar_select %p841_p7, 1, 0 }
  0x10   : > { %s569_s27 = sshll.u32 %s850_s25, 3  ;;  %s857_s30 = scalar_lea.hbm %s1007_s0, %s581_s26 }
  0x11   : > { %s162_s4 = scalar_lea.vmem [#allocation2], %s569_s27  ;;  %p861_p9 = pnand %p594_p8, %p834_p3 }
  0x12   : > { %s172_s5 = sshll.u32 %s162_s4, 4  ;;  %s159_s7 = scalar_lea.sflag [#allocation3], %s850_s25  ;;  %s865_s5 = int_to_ptr.vmem [resolvable:$true] %s172_s5 }
  0x13   : > { %s657_s8 = scalar_lea.hbm %s857_s30, 128  ;;  %p659_p13 = pneg %p861_p9 }
  0x14   : > { %p658_p12 = scmp.ne.s32.totalorder %s857_s30, %s657_s8  ;;  %s662_s11 = scalar_lea.hbm %s1007_s0, 256 }
  0x15   : > { %p663_p2 = scmp.lt.u32.totalorder %s857_s30, %s1007_s0  ;;  %p664_p3 = scmp.lt.u32.totalorder %s662_s11, %s657_s8 }
  0x16   : > { %p660_p0 = pnand %p659_p13, %p658_p12  ;;  %p666_p5 = scmp.lt.u32.totalorder %s657_s8, %s857_s30 }
  0x17   : > { %p665_p4 = por %p664_p3, %p663_p2 }
  0x18   : > { %p661_p1 = pneg %p660_p0 }
  0x19   : > { %p667_p6 = por %p666_p5, %p665_p4 }
  0x1b   : > { %p668_p8 = pnand %p667_p6, %p661_p1 }
  0x1d   : > { %671 = shalt.err (!%p668_p8)
}
  0x1e   : > { %s672_s20 = scalar_lea.vmem %s865_s5, 128  ;;  %s773_s21 = smov [#allocation2]  }
  0x1f   : > { %p673_p12 = scmp.ne.s32.totalorder %s865_s5, %s672_s20  ;;  %s677_s22 = sshll.u32 %s773_s21, 4  ;;  %s678_s22 = int_to_ptr.vmem [resolvable:$false] %s677_s22 }
  0x20   : > { %s679_s26 = scalar_lea.vmem %s678_s22, 256  ;;  %p680_p11 = scmp.lt.s32.totalorder %s865_s5, %s678_s22 }
  0x21   : > { %p675_p0 = pnand %p673_p12, %p659_p13  ;;  %p681_p2 = scmp.lt.s32.totalorder %s679_s26, %s672_s20 }
  0x23   : > { %p676_p10 = pneg %p675_p0  ;;  %p682_p3 = por %p681_p2, %p680_p11 }
  0x25   : > { %p683_p4 = pnand %p682_p3, %p676_p10 }
  0x27   : > { %686 = shalt.err (!%p683_p4)
}
  0x28   : > { %590 = dma.hbm_to_vmem [thread:$0]  (!%p861_p9), %s857_s30, 128, %s865_s5, %s159_s7  }
  0x29   : > { %p1015_p1 = scmp.lt.s32.totalorder %s771_s17, 3  ;;  %p1016_p5 = scmp.ge.s32.totalorder %s771_s17, 1 }
  0x2a   : > { %s572_s28 = sshll.u32 %s850_s25, 1  ;;  %s582_s29 = sshll.u32 %s767_s16, 5 }
  0x2b   : > { %p899_p6 = pnand %p1016_p5, %p1015_p1  ;;  %s908_s9 = scalar_lea.hbm %s1008_s1, %s582_s29 }
  0x2c   : > { %s183_s10 = scalar_lea.vmem [#allocation4], %s572_s28  ;;  %s180_s30 = scalar_lea.sflag [#allocation5], %s850_s25 }
  0x2d   : > { %s1017_s27 = scalar_select %p899_p6, 1, 0 }
  0x2e   : > { %s193_s11 = sshll.u32 %s183_s10, 4  ;;  %s687_s5 = scalar_lea.hbm %s908_s9, 32  ;;  %s194_s11 = int_to_ptr.vmem [resolvable:$true] %s193_s11 }
  0x2f   : > { %p688_p10 = scmp.ne.s32.totalorder %s908_s9, %s687_s5  ;;  %s692_s18 = scalar_lea.hbm %s1008_s1, 64 }
  0x30   : > { %p693_p12 = scmp.lt.u32.totalorder %s908_s9, %s1008_s1  ;;  %p694_p0 = scmp.lt.u32.totalorder %s692_s18, %s687_s5 }
  0x31   : > { %p690_p11 = pnand %p688_p10, %p659_p13  ;;  %p696_p3 = scmp.lt.u32.totalorder %s687_s5, %s908_s9 }
  0x32   : > { %p695_p2 = por %p694_p0, %p693_p12 }
  0x33   : > { %p691_p8 = pneg %p690_p11 }
  0x34   : > { %p697_p4 = por %p696_p3, %p695_p2 }
  0x36   : > { %p698_p1 = pnand %p697_p4, %p691_p8 }
  0x38   : > { %701 = shalt.err (!%p698_p1)
}
  0x39   : > { %s702_s25 = scalar_lea.vmem %s194_s11, 32  ;;  %s774_s22 = smov [#allocation4]  }
  0x3a   : > { %p703_p5 = scmp.ne.s32.totalorder %s194_s11, %s702_s25  ;;  %s707_s26 = sshll.u32 %s774_s22, 4  ;;  %s708_s26 = int_to_ptr.vmem [resolvable:$false] %s707_s26 }
  0x3b   : > { %s709_s28 = scalar_lea.vmem %s708_s26, 64  ;;  %p710_p7 = scmp.lt.s32.totalorder %s194_s11, %s708_s26 }
  0x3c   : > { %p705_p10 = pnand %p703_p5, %p659_p13  ;;  %p711_p6 = scmp.lt.s32.totalorder %s709_s28, %s702_s25 }
  0x3e   : > { %p706_p11 = pneg %p705_p10  ;;  %p712_p0 = por %p711_p6, %p710_p7 }
  0x40   : > { %p713_p12 = pnand %p712_p0, %p706_p11 }
  0x42   : > { %716 = shalt.err (!%p713_p12)
}
  0x43   : > { %593 = dma.hbm_to_vmem [thread:$0]  (!%p861_p9), %s908_s9, 32, %s194_s11, %s180_s30  }
  0x44   : > { %p1018_p8 = scmp.ne.s32.totalorder %s1017_s27, 0 }
  0x45   : > { %s204_s29 = sand.u32 (!%p1018_p8), 1, %s755_s13   ;;  %p1019_p13 = scmp.ne.s32.totalorder (!%p1018_p8), %s1013_s23, 0 }
  0x46   : > { %202 = sbr.rel (%p1018_p8) target bundleno = 326 (0x146), region = 28  ;;  %s576_s4 = sshll.u32 (!%p1018_p8), %s204_s29, 3 }
  0x47   : > { %s205_s8 = scalar_lea.sflag (!%p1018_p8), [#allocation3], %s204_s29  ;;  %s208_s10 = scalar_lea.vmem (!%p1018_p8), [#allocation2], %s576_s4 }
  0x4d   : > { %742 = dma.done.wait (%p1019_p13), %s205_s8, 128  }
  0x4e   : > { %744 = vsyncadd (%p1019_p13), %s205_s8, 4294967168  ;;  %s577_s5 = sshll.u32 %s204_s29, 1  ;;  %s214_s7 = scalar_lea.sflag [#allocation5], %s204_s29 }
  0x4f   : > { %s937_s6 = scalar_lea.vmem [#allocation4], %s577_s5 }
  0x50   : > { %746 = dma.done.wait (%p1019_p13), %s214_s7, 32  }
  0x51   : > { %748 = vsyncadd (%p1019_p13), %s214_s7, 4294967264  ;;  %p248_p7 = scmp.lt.s32.totalorder %s763_s15, 1  ;;  %vm258_vm0 = vcmask 0   ;;  %vm275_vm1 = vcmask 1043456   ;;  %v775_v0 = vmov 0.0   ;;  %v261_v1 = vld [vmem:[%s208_s10] sm:$0xff]  ;;  %v318_v14 = vlaneseq }
  0x52   : > { %v273_v2 = vcombine.high %v261_v1, %v261_v1  ;;  %v276_v3 = vsel %vm275_vm1, %v261_v1, -inf  ;;  %v961_v22 = vld [vmem:[%s937_s6] sm:$0x3]  ;;  %vm413_vm7 = vcmask 1040384  }
  0x53   : > { %s1028_s15 = smov (!%p248_p7, %s763_s15), 1  ;;  %v277_v4 = vrot.slane %v276_v3, 4  ;;  %v319_v18 = vshrl.u32 %v318_v14, 7  ;;  %vm363_vm4 = vcmp.ne.s32.totalorder %v961_v22, 255 }
  0x54   : > { %s951_s11 = scalar_lea.vmem %s1009_s2, %s1028_s15  ;;  %v283_v5 = vsel %vm275_vm1, %v273_v2, -inf  ;;  %s253_s12 = scalar_lea.vmem %s1010_s3, %s1028_s15 }
  0x55   : > { %259 = vst.msk [vmem:[%s951_s11] sm:$0x1] %vm258_vm0, %v775_v0  ;;  %v278_v6 = vmax.f32 %v276_v3, %v277_v4  ;;  %v284_v7 = vrot.slane %v283_v5, 4  ;;  %v958_v21 = vsub.s32 0, %v319_v18  ;;  %v963_v24 = vsub.s32 1, %v319_v18 }
  0x56   : > { %v776_v4 = vmov 1966171168   ;;  %260 = vst.msk [vmem:[%s253_s12] sm:$0x1] %vm258_vm0, %v775_v0 }
  0x57   : > { %v279_v8 = vrot.slane %v278_v6, 2  ;;  %v285_v9 = vmax.f32 %v283_v5, %v284_v7  ;;  %v323_v25 = vrot.slane %v961_v22, %v958_v21  ;;  %v327_v26 = vrot.slane %v961_v22, %v963_v24 }
  0x58   : > { %v368_v5 = vunpack.c.l.s4 %v776_v4 }
  0x59   : > { %v280_v10 = vmax.f32 %v278_v6, %v279_v8  ;;  %v286_v11 = vrot.slane %v285_v9, 2  ;;  %vm328_vm2 = vcmp.eq.s32.totalorder %v319_v18, %v323_v25  ;;  %vm329_vm3 = vcmp.eq.s32.totalorder %v319_v18, %v327_v26 }
  0x5a   : > { %v369_v7 = vunpack.c.0.s8 %v368_v5  ;;  %v777_v8 = vmov 1  }
  0x5b   : > { %v281_v12 = vrot.slane %v280_v10, 1  ;;  %v287_v13 = vmax.f32 %v285_v9, %v286_v11  ;;  %v366_v9 = vcombine.low %v777_v8, %v777_v8 }
  0x5d   : > { %v282_v15 = vmax.f32 %v280_v10, %v281_v12  ;;  %v288_v16 = vrot.slane %v287_v13, 1  ;;  %v372_v10 = vsub.s32 %v369_v7, %v319_v18 }
  0x5f   : > { %v289_v17 = vmax.f32 %v287_v13, %v288_v16  ;;  %v373_v13 = vrot.slane %v366_v9, %v372_v10 }
  0x61   : > { %v292_v19 = vcombine.low %v282_v15, %v289_v17 }
  0x63   : > { %v294_v20 = vsub.f32 %v261_v1, %v292_v19 }
  0x65   : > { %v295_v23 = vmul.f32 1.442695, %v294_v20  ;;  %v331_v27 = vcombine.high %v294_v20, %v294_v20  ;;  %v333_v28 = vsel %vm328_vm2, %v294_v20, 0.0  ;;  %v380_v20 = vrot.slane %v373_v13, %v372_v10 }
  0x66   : > { %v335_v31 = vsel %vm275_vm1, %v333_v28, 0.0 }
  0x67   : > { %647 = vpow2.f32 %v295_v23  ;;  %v334_v29 = vsel %vm329_vm3, %v331_v27, 0.0  ;;  %v336_v37 = vrot.slane %v335_v31, 4  ;;  %vm381_vm5 = vcmp.ne.s32.totalorder %v380_v20, 0 }
  0x68   : > { %v342_v35 = vsel %vm275_vm1, %v334_v29, 0.0  ;;  %vm382_vm6 = vmand %vm363_vm4, %vm381_vm5 }
  0x69   : > { %v343_v40 = vrot.slane %v342_v35, 4  ;;  %v337_v43 = vadd.f32 %v336_v37, %v335_v31  ;;  %v578_v18 = vsel %vm382_vm6, 1.0, %v775_v0 }
  0x6a   : > { %v429_v31 = vrot.slane %v578_v18, %v963_v24 }
  0x6b   : > { %v344_v46 = vadd.f32 %v343_v40, %v342_v35  ;;  %v338_v49 = vrot.slane %v337_v43, 2  ;;  %v437_v40 = vld [vmem:[%s951_s11] sm:$0x1] }
  0x6c   : > { %v433_v37 = vsel %vm413_vm7, %v429_v31, 0.0 }
  0x6d   : > { %v345_v52 = vrot.slane %v344_v46, 2  ;;  %v339_v54 = vadd.f32 %v338_v49, %v337_v43 }
  0x6f   : > { %v346_v55 = vadd.f32 %v345_v52, %v344_v46  ;;  %v340_v56 = vrot.slane %v339_v54, 1 }
  0x71   : > { %v648_v30 = vpop.eup %647  ;;  %v347_v57 = vrot.slane %v346_v55, 1  ;;  %v341_v58 = vadd.f32 %v340_v56, %v339_v54 }
  0x72   : > { %v298_v32 = vcombine.high %v648_v30, %v648_v30  ;;  %v300_v33 = vsel %vm275_vm1, %v648_v30, 0.0  ;;  %v425_v30 = vrot.slane %v578_v18, %v958_v21 }
  0x73   : > { %v301_v34 = vrot.slane %v300_v33, 4  ;;  %v348_v61 = vadd.f32 %v347_v57, %v346_v55 }
  0x74   : > { %v307_v36 = vsel %vm275_vm1, %v298_v32, 0.0 }
  0x75   : > { %v302_v38 = vadd.f32 %v301_v34, %v300_v33  ;;  %v308_v39 = vrot.slane %v307_v36, 4 }
  0x77   : > { %v303_v41 = vrot.slane %v302_v38, 2  ;;  %v309_v42 = vadd.f32 %v308_v39, %v307_v36  ;;  %v432_v36 = vsel %vm413_vm7, %v425_v30, 0.0 }
  0x78   : > { %v434_v39 = vadd.f32 %v433_v37, %v432_v36 }
  0x79   : > { %v304_v44 = vadd.f32 %v303_v41, %v302_v38  ;;  %v310_v45 = vrot.slane %v309_v42, 2 }
  0x7b   : > { %v305_v47 = vrot.slane %v304_v44, 1  ;;  %v311_v48 = vadd.f32 %v310_v45, %v309_v42  ;;  %v441_v42 = vld [vmem:[%s253_s12] sm:$0x1] }
  0x7d   : > { %v306_v50 = vadd.f32 %v305_v47, %v304_v44  ;;  %v312_v51 = vrot.slane %v311_v48, 1 }
  0x7f   : > { %v313_v53 = vadd.f32 %v312_v51, %v311_v48  ;;  %649 = vlog2.f32 %v306_v50 }
  0x81   : > { %651 = vlog2.f32 %v313_v53 }
  0x89   : > { %v650_v59 = vpop.eup %649 }
  0x8a   : > { %v315_v60 = vmul.f32 0.6931472, %v650_v59 }
  0x8b   : > { %v652_v62 = vpop.eup %651 }
  0x8c   : > { %v317_v63 = vmul.f32 0.6931472, %v652_v62  ;;  %v349_v1 = vsub.f32 %v341_v58, %v315_v60 }
  0x8e   : > { %v350_v2 = vsub.f32 %v348_v61, %v317_v63  ;;  %v351_v3 = vmul.f32 1.442695, %v349_v1 }
  0x90   : > { %653 = vpow2.f32 %v351_v3  ;;  %v353_v6 = vmul.f32 1.442695, %v350_v2 }
  0x92   : > { %655 = vpow2.f32 %v353_v6 }
  0x9a   : > { %v654_v11 = vpop.eup %653 }
  0x9b   : > { %v355_v12 = vsub.f32 1.0, %v654_v11 }
  0x9c   : > { %v656_v14 = vpop.eup %655 }
  0x9d   : > { %v356_v15 = vsub.f32 1.0, %v656_v14  ;;  %v357_v16 = vmul.f32 %v355_v12, %v355_v12 }
  0x9f   : > { %v358_v17 = vmul.f32 %v356_v15, %v356_v15  ;;  %v359_v19 = vmul.f32 %v357_v16, %v349_v1 }
  0xa1   : > { %v360_v23 = vmul.f32 %v358_v17, %v350_v2  ;;  %v361_v25 = vsub.f32 0.0, %v359_v19 }
  0xa3   : > { %v362_v26 = vsub.f32 0.0, %v360_v23 }
  0xa5   : > { %v385_v27 = vcombine.low %v361_v25, %v362_v26 }
  0xa7   : > { %v392_v28 = vrot.slane %v385_v27, %v372_v10 }
  0xa9   : > { %v399_v29 = vrot.slane %v392_v28, %v372_v10 }
  0xab   : > { %v401_v32 = vsel %vm382_vm6, %v399_v29, 0.0 }
  0xac   : > { %v406_v33 = vrot.slane %v401_v32, %v958_v21  ;;  %v410_v22 = vrot.slane %v401_v32, %v963_v24 }
  0xae   : > { %v414_v34 = vsel %vm413_vm7, %v406_v33, 0.0  ;;  %v415_v35 = vsel %vm413_vm7, %v410_v22, 0.0 }
  0xaf   : > { %v416_v38 = vadd.f32 %v415_v35, %v414_v34 }
  0xb1   : > { %417 = vadd.xlane.f32.xlu0 %v416_v38 }
  0xb5   : > { %435 = vadd.xlane.f32.xlu0 %v434_v39 }
 0x13e   : > { %v418_v21 = vpop.xlane.xlu0 %417 }
 0x13f   : > { %v438_v41 = vadd.f32 %v437_v40, %v418_v21 }
 0x141   : > { %440 = vst.msk [vmem:[%s951_s11] sm:$0x1] %vm258_vm0, %v438_v41 }
 0x142   : > { %v436_v24 = vpop.xlane.xlu0 %435 }
 0x143   : > { %v442_v43 = vadd.f32 %v441_v42, %v436_v24 }
 0x145   : > { %443 = vst.msk [vmem:[%s253_s12] sm:$0x1] %vm258_vm0, %v442_v43 }
 0x146 PF: > { %s20_s17 = sadd.s32 1, %s771_s17   ;;  %s1020_s12 = smov %s755_s13 }
 0x147   : > { %p17_p9 = scmp.ge.s32.totalorder %s20_s17, 4   ;;  %s1021_s13 = smov %s759_s14 }
 0x148   : > { %s1022_s14 = smov %s847_s24  ;;  %s1023_s15 = smov %s767_s16 }
 0x149   : > { %s1024_s16 = smov %s1026_s19  ;;  %19 = sbr.rel (!%p17_p9) target bundleno = 6 (0x6), region = 97 }
 0x150   :  { %473 = vsyncpa [#allocation3], 1 }
 0x151   :  { %475 = vsyncpa [#allocation3 + $0x1], 1 }
 0x152   :  { %476 = vsyncpa [#allocation5], 1 }
 0x153   :  { %478 = vsyncpa [#allocation5 + $0x1], 1 }

</bundles_post_ra>
